<compile_context>
chip_gen: v7x
topology: tpu7x:2x2x1
jax: 0.10.0
libtpu: 0.0.40
codegen_flags: <defaults>
</compile_context>

<pallas_src>
import functools

import jax
import jax.numpy as jnp
from jax.experimental import pallas as pl
from jax.experimental.pallas import tpu as pltpu


def _layernorm_kernel(x_ref, g_ref, b_ref, o_ref, *, eps, inv_c):
    # x_ref: (TN, C, THW)   g_ref/b_ref: (1, C, 1)
    x = x_ref[...]
    # Reductions in f32 (tile is bounded, so the transient f32 view is small).
    xf = x.astype(jnp.float32)
    s1 = jnp.sum(xf, axis=1, keepdims=True)            # (TN, 1, THW)
    s2 = jnp.sum(xf * xf, axis=1, keepdims=True)       # fused single pass
    mean = s1 * inv_c
    # Biased variance (unbiased=False); guard against tiny negative values
    # from catastrophic cancellation in the fused form.
    var = jnp.maximum(s2 * inv_c - mean * mean, 0.0)
    inv = jax.lax.rsqrt(var + eps)                     # EUP slot (free-ish)

    # Elementwise epilogue in the input's compute dtype (bf16 on v6e/v7x).
    cdt = jnp.float32 if x.dtype == jnp.float32 else x.dtype
    g = g_ref[...].astype(cdt)                         # (1, C, 1)
    b = b_ref[...].astype(cdt)
    xm = (x.astype(cdt) - mean.astype(cdt)) * inv.astype(cdt)
    o_ref[...] = (xm * g + b).astype(o_ref.dtype)


def _choose_tiles(N, C, HW, itemsize):
    """Pick (TN, THW): lane tile + image batch per grid step."""
    # Lane tile: largest multiple of 128 that divides HW, capped so the
    # per-block input bytes stay ~2 MiB (in+out double buffers + f32 temps
    # then stay well under v7x's 32 MiB scoped / v5e's 16 MiB scoped VMEM).
    budget = 2 * 1024 * 1024
    max_lanes = max(128, (budget // max(C * itemsize, 1)) // 128 * 128)
    thw = HW
    if HW % 128 == 0:
        t = min(HW, max_lanes, 2048)
        t = (t // 128) * 128
        while t >= 128 and HW % t != 0:
            t -= 128
        if t >= 128:
            thw = t
    # Batch small images so each step moves >= ~512 KiB.
    tn = 1
    if thw == HW:
        block_bytes = C * thw * itemsize
        target = 512 * 1024
        tn = max(1, min(N, target // max(block_bytes, 1)))
        while N % tn != 0:
            tn -= 1
    return tn, thw


def layer_norm_nchw(x, g, b, eps=1e-5):
    """Channel LayerNorm matching the PyTorch module.

    x: (N, C, H, W)   g, b: (1, C, 1, 1)
    """
    N, C, H, W = x.shape
    HW = H * W
    x3 = x.reshape(N, C, HW)
    g3 = g.reshape(1, C, 1)
    b3 = b.reshape(1, C, 1)

    TN, THW = _choose_tiles(N, C, HW, x.dtype.itemsize)

    kernel = functools.partial(_layernorm_kernel, eps=float(eps), inv_c=1.0 / C)

    out3 = pl.pallas_call(
        kernel,
        out_shape=jax.ShapeDtypeStruct((N, C, HW), x.dtype),
        grid=(N // TN, HW // THW),
        in_specs=[
            pl.BlockSpec((TN, C, THW), lambda n, t: (n, 0, t)),
            pl.BlockSpec((1, C, 1), lambda n, t: (0, 0, 0)),
            pl.BlockSpec((1, C, 1), lambda n, t: (0, 0, 0)),
        ],
        out_specs=pl.BlockSpec((TN, C, THW), lambda n, t: (n, 0, t)),
        compiler_params=pltpu.CompilerParams(
            dimension_semantics=("parallel", "parallel")),
    )(x3, g3, b3)
    return out3.reshape(N, C, H, W)


if __name__ == "__main__":
    key = jax.random.PRNGKey(0)
    kx, kg, kb = jax.random.split(key, 3)

    N, C, H, W = 2, 4, 16, 16
    x = jax.random.normal(kx, (N, C, H, W), dtype=jnp.float32)
    # PyTorch init: g = ones, b = zeros (perturbed deterministically so the
    # affine part is actually exercised).
    g = jnp.ones((1, C, 1, 1), jnp.float32) + 0.1 * jax.random.normal(kg, (1, C, 1, 1))
    b = jnp.zeros((1, C, 1, 1), jnp.float32) + 0.1 * jax.random.normal(kb, (1, C, 1, 1))

    out = layer_norm_nchw(x, g, b, eps=1e-5)
    out = jax.block_until_ready(out)

    # Reference check (plain JAX, two-pass biased variance like PyTorch).
    mean = jnp.mean(x, axis=1, keepdims=True)
    var = jnp.mean((x - mean) ** 2, axis=1, keepdims=True)
    ref = (x - mean) / jnp.sqrt(var + 1e-5) * g + b
    assert jnp.allclose(out, ref, atol=1e-5, rtol=1e-5), "mismatch vs reference"

    print("KERNEL_OK")
</pallas_src>

<mosaic_0001>
module attributes {stable_mosaic.version = 11 : i64} {
  func.func @_layernorm_kernel(%arg0: i32, %arg1: i32, %arg2: memref<2x4x256xf32, #tpu.memory_space<vmem>>, %arg3: memref<1x4x1xf32, #tpu.memory_space<vmem>>, %arg4: memref<1x4x1xf32, #tpu.memory_space<vmem>>, %arg5: memref<2x4x256xf32, #tpu.memory_space<vmem>>) attributes {dimension_semantics = [#tpu.dimension_semantics<parallel>, #tpu.dimension_semantics<parallel>], iteration_bounds = array<i64: 1, 1>, scalar_prefetch = 0 : i64, scratch_operands = 0 : i64, tpu.core_type = #tpu.core_type<tc>, window_params = [{transform_indices = @transform_0, window_bounds = array<i64: 2, 4, 256>}, {pipeline_mode = #tpu.pipeline_mode<synchronous>, transform_indices = @transform_1, window_bounds = array<i64: 1, 4, 1>}, {pipeline_mode = #tpu.pipeline_mode<synchronous>, transform_indices = @transform_2, window_bounds = array<i64: 1, 4, 1>}, {transform_indices = @transform_3, window_bounds = array<i64: 2, 4, 256>}]} {
    %c0 = arith.constant 0 : index
    %c0_0 = arith.constant 0 : index
    %c0_1 = arith.constant 0 : index
    %0 = vector.load %arg2[%c0, %c0_0, %c0_1] : memref<2x4x256xf32, #tpu.memory_space<vmem>>, vector<2x4x256xf32>
    %cst = arith.constant dense<0.000000e+00> : vector<2x256xf32>
    %1 = vector.multi_reduction <add>, %0, %cst [1] : vector<2x4x256xf32> to vector<2x256xf32>
    %2 = vector.shape_cast %1 : vector<2x256xf32> to vector<2x1x256xf32>
    %3 = arith.mulf %0, %0 : vector<2x4x256xf32>
    %cst_2 = arith.constant dense<0.000000e+00> : vector<2x256xf32>
    %4 = vector.multi_reduction <add>, %3, %cst_2 [1] : vector<2x4x256xf32> to vector<2x256xf32>
    %5 = vector.shape_cast %4 : vector<2x256xf32> to vector<2x1x256xf32>
    %cst_3 = arith.constant 2.500000e-01 : f32
    %6 = vector.broadcast %cst_3 : f32 to vector<2x1x256xf32>
    %7 = arith.mulf %2, %6 : vector<2x1x256xf32>
    %cst_4 = arith.constant 2.500000e-01 : f32
    %8 = vector.broadcast %cst_4 : f32 to vector<2x1x256xf32>
    %9 = arith.mulf %5, %8 : vector<2x1x256xf32>
    %10 = arith.mulf %7, %7 : vector<2x1x256xf32>
    %11 = arith.subf %9, %10 : vector<2x1x256xf32>
    %cst_5 = arith.constant 0.000000e+00 : f32
    %12 = vector.broadcast %cst_5 : f32 to vector<2x1x256xf32>
    %13 = arith.maximumf %11, %12 : vector<2x1x256xf32>
    %cst_6 = arith.constant 9.99999974E-6 : f32
    %14 = vector.broadcast %cst_6 : f32 to vector<2x1x256xf32>
    %15 = arith.addf %13, %14 : vector<2x1x256xf32>
    %16 = math.rsqrt %15 : vector<2x1x256xf32>
    %c0_7 = arith.constant 0 : index
    %c0_8 = arith.constant 0 : index
    %c0_9 = arith.constant 0 : index
    %17 = vector.load %arg3[%c0_7, %c0_8, %c0_9] : memref<1x4x1xf32, #tpu.memory_space<vmem>>, vector<1x4x1xf32>
    %c0_10 = arith.constant 0 : index
    %c0_11 = arith.constant 0 : index
    %c0_12 = arith.constant 0 : index
    %18 = vector.load %arg4[%c0_10, %c0_11, %c0_12] : memref<1x4x1xf32, #tpu.memory_space<vmem>>, vector<1x4x1xf32>
    %19 = vector.broadcast %7 : vector<2x1x256xf32> to vector<2x4x256xf32>
    %20 = arith.subf %0, %19 : vector<2x4x256xf32>
    %21 = vector.broadcast %16 : vector<2x1x256xf32> to vector<2x4x256xf32>
    %22 = arith.mulf %20, %21 : vector<2x4x256xf32>
    %23 = vector.broadcast %17 : vector<1x4x1xf32> to vector<2x4x256xf32>
    %24 = arith.mulf %22, %23 : vector<2x4x256xf32>
    %25 = vector.broadcast %18 : vector<1x4x1xf32> to vector<2x4x256xf32>
    %26 = arith.addf %24, %25 : vector<2x4x256xf32>
    %c0_13 = arith.constant 0 : index
    %c0_14 = arith.constant 0 : index
    %c0_15 = arith.constant 0 : index
    %27 = vector.load %arg5[%c0_13, %c0_14, %c0_15] : memref<2x4x256xf32, #tpu.memory_space<vmem>>, vector<2x4x256xf32>
    tpu.vector_store %arg5[%c0_13, %c0_14, %c0_15], %26 {strides = array<i32>} : memref<2x4x256xf32, #tpu.memory_space<vmem>>, vector<2x4x256xf32>,
    return
  }
  func.func @transform_0(%arg0: i32, %arg1: i32) -> (i32, i32, i32) {
    %c0_i32 = arith.constant 0 : i32
    %c0_i32_0 = arith.constant 0 : i32
    return %arg0, %c0_i32, %arg1 : i32, i32, i32
  }
  func.func @transform_1(%arg0: i32, %arg1: i32) -> (i32, i32, i32) {
    %c0_i32 = arith.constant 0 : i32
    %c0_i32_0 = arith.constant 0 : i32
    %c0_i32_1 = arith.constant 0 : i32
    %c0_i32_2 = arith.constant 0 : i32
    return %c0_i32, %c0_i32_0, %c0_i32_1 : i32, i32, i32
  }
  func.func @transform_2(%arg0: i32, %arg1: i32) -> (i32, i32, i32) {
    %c0_i32 = arith.constant 0 : i32
    %c0_i32_0 = arith.constant 0 : i32
    %c0_i32_1 = arith.constant 0 : i32
    %c0_i32_2 = arith.constant 0 : i32
    return %c0_i32, %c0_i32_0, %c0_i32_1 : i32, i32, i32
  }
  func.func @transform_3(%arg0: i32, %arg1: i32) -> (i32, i32, i32) {
    %c0_i32 = arith.constant 0 : i32
    %c0_i32_0 = arith.constant 0 : i32
    return %arg0, %c0_i32, %arg1 : i32, i32, i32
  }
}

</mosaic_0001>

<bundles_post_ra>
// kernel: tpu_custom_call.1
= control target key start
LH: loop header
LB: loop body
LE: loop exit
PB: predicated region body
PF: predicated region fallthrough
CT: control target
= control target key end

     0   :  { %8 = vsyncpa [#allocation3], 0  ;;  %s350_s0 = inlined_call_operand.hbm [shape: f32[2,4,256], index: 0, kind: input, shape index: {}]   ;;  %s351_s1 = inlined_call_operand.vmem [shape: f32[1,4,1], index: 1, kind: input, shape index: {}]   ;;  %s352_s2 = inlined_call_operand.vmem [shape: f32[1,4,1], index: 2, kind: input, shape index: {}]   ;;  %s353_s3 = inlined_call_operand.hbm [shape: f32[2,4,256], index: 3, kind: output, shape index: {}]  }
   0x1   :  { %9 = vsyncpa [#allocation4], 0  ;;  %s264_s12 = smov [#allocation2]   ;;  %s216_s16 = scalar_lea.hbm %s350_s0, 256 }
   0x2   :  { %s15_s13 = sshll.u32 %s264_s12, 4  ;;  %p217_p0 = scmp.ne.s32.totalorder %s350_s0, %s216_s16  ;;  %s16_s13 = int_to_ptr.vmem [resolvable:$true] %s15_s13 }
   0x3   :  { %p220_p1 = scmp.lt.u32.totalorder %s216_s16, %s350_s0 }
   0x5   :  { %p222_p2 = pnand %p220_p1, %p217_p0 }
   0x7   :  { %225 = shalt.err (!%p222_p2)
}
   0x8   :  { %s226_s21 = scalar_lea.vmem %s16_s13, 256  ;;  %p231_p4 = scmp.lt.s32.totalorder %s16_s13, %s16_s13 }
   0x9   :  { %p227_p3 = scmp.ne.s32.totalorder %s16_s13, %s226_s21  ;;  %p232_p5 = scmp.lt.s32.totalorder %s226_s21, %s226_s21 }
   0xb   :  { %p233_p6 = por %p232_p5, %p231_p4 }
   0xd   :  { %p234_p7 = pnand %p233_p6, %p227_p3 }
   0xf   :  { %237 = shalt.err (!%p234_p7)
}
  0x10   :  { %s265_s22 = smov 128   ;;  %s266_s23 = smov 8  }
  0x11   :  { %21 = dma.hbm_to_vmem [thread:$0]  %s350_s0, 256, %s16_s13, [#allocation3], %s265_s22, %s265_s22, %s266_s23  }
  0x12   :  { %260 = dma.done.wait [#allocation3], 256  }
  0x13   :  { %261 = vsyncadd [#allocation3], 4294967040  ;;  %v267_v0 = vmov 0   ;;  %v130_v1 = vld [vmem:[%s351_s1] sm:$0xf]  ;;  %v313_v4 = vld [vmem:[#allocation2 + $0x8] sm:$0xff] }
  0x14   :  { %205 = vset.pattern.permute.xlu0 %v267_v0  ;;  %v131_v2 = vld [vmem:[%s352_s2] sm:$0xf]  ;;  %vm37_vm0 = vcmask 1043456   ;;  %v34_v7 = vcombine.high %v313_v4, %v313_v4  ;;  %v67_v8 = vmul.f32 %v313_v4, %v313_v4  ;;  %s269_s0 = smov [#allocation5]  }
  0x15   :  { %154 = vperm.xlu0 %205, %v130_v1   ;;  %v311_v3 = vld [vmem:[#allocation2] sm:$0xff]  ;;  %v52_v12 = vsel %vm37_vm0, %v313_v4, 0.0  ;;  %s187_s1 = sshll.u32 %s269_s0, 4  ;;  %s188_s1 = int_to_ptr.vmem [resolvable:$true] %s187_s1 }
  0x16   :  { %v33_v5 = vcombine.high %v311_v3, %v311_v3  ;;  %v66_v6 = vmul.f32 %v311_v3, %v311_v3  ;;  %v38_v9 = vsel %vm37_vm0, %v311_v3, 0.0  ;;  %v59_v14 = vsel %vm37_vm0, %v34_v7, 0.0  ;;  %s238_s2 = scalar_lea.vmem %s188_s1, 256  ;;  %p243_p9 = scmp.lt.s32.totalorder %s188_s1, %s188_s1 }
  0x17   :  { %v39_v13 = vrot.slane %v38_v9, 4  ;;  %v71_v15 = vcombine.high %v67_v8, %v67_v8  ;;  %v53_v18 = vrot.slane %v52_v12, 4  ;;  %v60_v20 = vrot.slane %v59_v14, 4  ;;  %p239_p8 = scmp.ne.s32.totalorder %s188_s1, %s238_s2  ;;  %p244_p10 = scmp.lt.s32.totalorder %s238_s2, %s238_s2 }
  0x18   :  { %v45_v10 = vsel %vm37_vm0, %v33_v5, 0.0  ;;  %v70_v11 = vcombine.high %v66_v6, %v66_v6  ;;  %v74_v17 = vsel %vm37_vm0, %v66_v6, 0.0  ;;  %v88_v21 = vsel %vm37_vm0, %v67_v8, 0.0 }
  0x19   :  { %168 = vperm.xlu0 %205, %v131_v2   ;;  %v46_v16 = vrot.slane %v45_v10, 4  ;;  %v40_v22 = vadd.f32 %v39_v13, %v38_v9  ;;  %v75_v23 = vrot.slane %v74_v17, 4  ;;  %v95_v24 = vsel %vm37_vm0, %v71_v15, 0.0  ;;  %p245_p11 = por %p244_p10, %p243_p9 }
  0x1a   :  { %v81_v19 = vsel %vm37_vm0, %v70_v11, 0.0  ;;  %v54_v27 = vadd.f32 %v53_v18, %v52_v12  ;;  %v89_v28 = vrot.slane %v88_v21, 4  ;;  %v61_v29 = vadd.f32 %v60_v20, %v59_v14 }
  0x1b   :  { %v47_v25 = vadd.f32 %v46_v16, %v45_v10  ;;  %v82_v26 = vrot.slane %v81_v19, 4  ;;  %v96_v30 = vrot.slane %v95_v24, 4  ;;  %v41_v31 = vrot.slane %v40_v22, 2  ;;  %p246_p12 = pnand %p245_p11, %p239_p8 }
  0x1c   :  { %v76_v32 = vadd.f32 %v75_v23, %v74_v17  ;;  %v55_v35 = vrot.slane %v54_v27, 2  ;;  %v90_v36 = vadd.f32 %v89_v28, %v88_v21  ;;  %v62_v37 = vrot.slane %v61_v29, 2 }
  0x1d   :  { %v48_v33 = vrot.slane %v47_v25, 2  ;;  %v83_v34 = vadd.f32 %v82_v26, %v81_v19  ;;  %v97_v38 = vadd.f32 %v96_v30, %v95_v24  ;;  %v42_v39 = vadd.f32 %v41_v31, %v40_v22 }
  0x1e   :  { %v77_v40 = vrot.slane %v76_v32, 2  ;;  %v56_v43 = vadd.f32 %v55_v35, %v54_v27  ;;  %v91_v44 = vrot.slane %v90_v36, 2  ;;  %v63_v45 = vadd.f32 %v62_v37, %v61_v29 }
  0x1f   :  { %v49_v41 = vadd.f32 %v48_v33, %v47_v25  ;;  %v84_v42 = vrot.slane %v83_v34, 2  ;;  %v98_v46 = vrot.slane %v97_v38, 2  ;;  %v43_v47 = vrot.slane %v42_v39, 1 }
  0x20   :  { %v78_v48 = vadd.f32 %v77_v40, %v76_v32  ;;  %v57_v51 = vrot.slane %v56_v43, 1  ;;  %v92_v52 = vadd.f32 %v91_v44, %v90_v36  ;;  %v64_v53 = vrot.slane %v63_v45, 1 }
  0x21   :  { %v50_v49 = vrot.slane %v49_v41, 1  ;;  %v85_v50 = vadd.f32 %v84_v42, %v83_v34  ;;  %v99_v54 = vadd.f32 %v98_v46, %v97_v38  ;;  %v44_v55 = vadd.f32 %v43_v47, %v42_v39 }
  0x22   :  { %v79_v56 = vrot.slane %v78_v48, 1  ;;  %v58_v59 = vadd.f32 %v57_v51, %v56_v43  ;;  %v93_v60 = vrot.slane %v92_v52, 1  ;;  %v65_v61 = vadd.f32 %v64_v53, %v63_v45 }
  0x23   :  { %v51_v57 = vadd.f32 %v50_v49, %v49_v41  ;;  %v86_v58 = vrot.slane %v85_v50, 1  ;;  %v100_v62 = vrot.slane %v99_v54, 1  ;;  %v102_v0 = vmul.f32 0.25, %v44_v55 }
  0x24   :  { %v80_v63 = vadd.f32 %v79_v56, %v78_v48  ;;  %v94_v5 = vadd.f32 %v93_v60, %v92_v52  ;;  %v104_v6 = vmul.f32 0.25, %v58_v59  ;;  %v105_v8 = vmul.f32 0.25, %v65_v61 }
  0x25   :  { %v87_v1 = vadd.f32 %v86_v58, %v85_v50  ;;  %v103_v2 = vmul.f32 0.25, %v51_v57  ;;  %v101_v7 = vadd.f32 %v100_v62, %v99_v54  ;;  %v110_v10 = vmul.f32 %v102_v0, %v102_v0 }
  0x26   :  { %v106_v9 = vmul.f32 0.25, %v80_v63  ;;  %v108_v13 = vmul.f32 0.25, %v94_v5  ;;  %v112_v14 = vmul.f32 %v104_v6, %v104_v6  ;;  %v113_v16 = vmul.f32 %v105_v8, %v105_v8 }
  0x27   :  { %v107_v11 = vmul.f32 0.25, %v87_v1  ;;  %v111_v12 = vmul.f32 %v103_v2, %v103_v2  ;;  %v109_v15 = vmul.f32 0.25, %v101_v7  ;;  %v268_v29 = vmov 839922192  }
  0x28   :  { %v114_v17 = vsub.f32 %v106_v9, %v110_v10  ;;  %v116_v19 = vsub.f32 %v108_v13, %v112_v14  ;;  %v157_v30 = vunpack.c.l.s4 %v268_v29  ;;  %v159_v31 = vlaneseq }
  0x29   :  { %v115_v18 = vsub.f32 %v107_v11, %v111_v12  ;;  %v117_v20 = vsub.f32 %v109_v15, %v113_v16  ;;  %v136_v37 = vcombine.low %v102_v0, %v103_v2  ;;  %v137_v38 = vcombine.low %v104_v6, %v105_v8 }
  0x2a   :  { %v118_v21 = vmax.f32 %v114_v17, 0.0  ;;  %v120_v23 = vmax.f32 %v116_v19, 0.0  ;;  %v158_v34 = vunpack.c.0.s8 %v157_v30  ;;  %v160_v35 = vshrl.u32 %v159_v31, 7 }
  0x2b   :  { %v119_v22 = vmax.f32 %v115_v18, 0.0  ;;  %v121_v24 = vmax.f32 %v117_v20, 0.0  ;;  %v140_v41 = vsub.f32 %v311_v3, %v136_v37  ;;  %v141_v42 = vsub.f32 %v313_v4, %v137_v38 }
  0x2c   :  { %v122_v25 = vadd.f32 1e-05, %v118_v21  ;;  %v124_v27 = vadd.f32 1e-05, %v120_v23  ;;  %v161_v40 = vsub.s32 %v158_v34, %v160_v35 }
  0x2d   :  { %v123_v26 = vadd.f32 1e-05, %v119_v22  ;;  %v125_v28 = vadd.f32 1e-05, %v121_v24 }
  0x2e   :  { %208 = vrsqrt.f32 %v122_v25 }
  0x2f   :  { %210 = vrsqrt.f32 %v123_v26 }
  0x30   :  { %212 = vrsqrt.f32 %v124_v27 }
  0x31   :  { %214 = vrsqrt.f32 %v125_v28 }
  0x38   :  { %v209_v32 = vpop.eup %208 }
  0x39   :  { %v211_v33 = vpop.eup %210 }
  0x3a   :  { %v213_v36 = vpop.eup %212  ;;  %v146_v43 = vcombine.low %v209_v32, %v211_v33 }
  0x3b   :  { %v215_v39 = vpop.eup %214 }
  0x3c   :  { %v147_v44 = vcombine.low %v213_v36, %v215_v39  ;;  %v150_v46 = vmul.f32 %v146_v43, %v140_v41 }
  0x3e   :  { %v151_v47 = vmul.f32 %v147_v44, %v141_v42 }
  0x94   :  { %v155_v45 = vpop.permute.xlu0 %154 }
  0x95   :  { %v162_v48 = vrot.slane %v155_v45, %v161_v40 }
  0x97   :  { %v164_v50 = vmul.f32 %v162_v48, %v150_v46  ;;  %v165_v51 = vmul.f32 %v162_v48, %v151_v47 }
  0x98   :  { %v169_v49 = vpop.permute.xlu0 %168 }
  0x99   :  { %v176_v52 = vrot.slane %v169_v49, %v161_v40 }
  0x9b   :  { %v178_v53 = vadd.f32 %v176_v52, %v164_v50  ;;  %v179_v54 = vadd.f32 %v176_v52, %v165_v51 }
  0x9d   :  { %180 = vst [vmem:[#allocation5] sm:$0xff] %v178_v53  ;;  %181 = vst [vmem:[#allocation5 + $0x8] sm:$0xff] %v179_v54 }
  0x9e   :  { %249 = shalt.err (!%p246_p12)
}
  0x9f   :  { %s250_s5 = scalar_lea.hbm %s353_s3, 256 }
  0xa0   :  { %p251_p13 = scmp.ne.s32.totalorder %s353_s3, %s250_s5  ;;  %p254_p0 = scmp.lt.u32.totalorder %s250_s5, %s353_s3 }
  0xa2   :  { %p256_p1 = pnand %p254_p0, %p251_p13 }
  0xa4   :  { %259 = shalt.err (!%p256_p1)
}
  0xa5   :  { %193 = dma.vmem_to_hbm [thread:$0]  %s188_s1, 256, %s353_s3, [#allocation4], %s265_s22, %s265_s22, %s266_s23  }
  0xa6   :  { %262 = dma.done.wait [#allocation4], 256  }
  0xa7   :  { %263 = vsyncadd [#allocation4], 4294967040 }
  0xa8   :  { %197 = vsyncpa [#allocation3], 1 }
  0xa9   :  { %198 = vsyncpa [#allocation4], 1 }

</bundles_post_ra>
